<compile_context>
chip_gen: v7x
topology: tpu7x:2x2x1
jax: 0.10.0
libtpu: 0.0.40
codegen_flags: <defaults>
</compile_context>

<pallas_src>
import functools

import jax
import jax.numpy as jnp
from jax.experimental import pallas as pl
from jax.experimental.pallas import tpu as pltpu


def _head_kernel(x_ref, w_ref, o_ref, *, head_size):
    """Single-invocation attention head.

    x_ref: (B, T, C) f32 in VMEM
    w_ref: (C, 3H)  f32 in VMEM  -- [Wk | Wq * H**-0.5 | Wv]
    o_ref: (B, T, H) f32 in VMEM
    """
    H = head_size

    # Feed the MXU bf16; accumulate in f32.
    x = x_ref[...].astype(jnp.bfloat16)          # (B, T, C)
    w = w_ref[...].astype(jnp.bfloat16)          # (C, 3H)

    # Fused K/Q/V projection: one contraction over C for all B*T rows.
    qkv = jax.lax.dot_general(
        x, w,
        dimension_numbers=(((2,), (0,)), ((), ())),
        preferred_element_type=jnp.float32)      # (B, T, 3H)

    k = qkv[..., :H].astype(jnp.bfloat16)        # (B, T, H)
    q = qkv[..., H:2 * H].astype(jnp.bfloat16)   # already scaled by H**-0.5
    v = qkv[..., 2 * H:].astype(jnp.bfloat16)

    # Scores: contract the head dim of q and k directly (no k.T transpose),
    # batched over B.
    wei = jnp.einsum('btd,bsd->bts', q, k,
                     preferred_element_type=jnp.float32)     # (B, T, T) f32

    # Numerically-stabilized softmax, f32 throughout; reciprocal on the EUP.
    wei = wei - jnp.max(wei, axis=-1, keepdims=True)
    p = jnp.exp(wei)
    p = p * pl.reciprocal(jnp.sum(p, axis=-1, keepdims=True), approx=True)

    # TODO(synk): dropout on `p` skipped (identity in eval mode).

    out = jnp.einsum('bts,bsd->btd', p.astype(jnp.bfloat16), v,
                     preferred_element_type=jnp.float32)     # (B, T, H)
    o_ref[...] = out.astype(o_ref.dtype)


def head_forward(x, wk, wq, wv):
    """x: (B, T, C) f32; wk/wq/wv: (C, H) f32 -> (B, T, H) f32."""
    B, T, C = x.shape
    H = wk.shape[1]

    # Fold the attention scale into the query weights and fuse the three
    # projection matrices into one (C, 3H) operand (one MXU push, one DMA).
    scale = jnp.float32(H) ** -0.5
    w_fused = jnp.concatenate([wk, wq * scale, wv], axis=1)  # (C, 3H)

    flops = (2 * B * T * C * (3 * H)        # fused projection
             + 2 * B * T * T * H            # q @ k^T
             + 2 * B * T * T * H)           # p @ v
    transcendentals = B * T * T             # exp in softmax
    bytes_accessed = 4 * (x.size + w_fused.size + B * T * H)

    kernel = functools.partial(_head_kernel, head_size=H)

    return pl.pallas_call(
        kernel,
        out_shape=jax.ShapeDtypeStruct((B, T, H), x.dtype),
        in_specs=[
            pl.BlockSpec(memory_space=pltpu.MemorySpace.VMEM),  # x (whole)
            pl.BlockSpec(memory_space=pltpu.MemorySpace.VMEM),  # fused weights
        ],
        out_specs=pl.BlockSpec(memory_space=pltpu.MemorySpace.VMEM),
        cost_estimate=pl.CostEstimate(
            flops=flops,
            transcendentals=transcendentals,
            bytes_accessed=bytes_accessed),
    )(x, w_fused)


def head_reference(x, wk, wq, wv):
    """Plain-JAX f32 reference mirroring the PyTorch forward (eval mode)."""
    k = x @ wk
    q = x @ wq
    v = x @ wv
    wei = (q @ jnp.swapaxes(k, -2, -1)) * (k.shape[-1] ** -0.5)
    wei = jax.nn.softmax(wei, axis=-1)
    return wei @ v


if __name__ == "__main__":
    # Small shapes consistent with the module: block_size -> T, n_embd -> C
    # (the real module uses n_embd=384; kept small here per instructions).
    B, T, C, H = 2, 8, 32, 16   # batch, seq (block_size), embed (n_embd), head_size

    key = jax.random.PRNGKey(0)
    kx, kk, kq, kv = jax.random.split(key, 4)

    x = jax.random.normal(kx, (B, T, C), dtype=jnp.float32)
    # Deterministic Linear(bias=False) weights, stored as (C, H).
    bound = 1.0 / (C ** 0.5)
    wk = jax.random.uniform(kk, (C, H), jnp.float32, -bound, bound)
    wq = jax.random.uniform(kq, (C, H), jnp.float32, -bound, bound)
    wv = jax.random.uniform(kv, (C, H), jnp.float32, -bound, bound)

    out = jax.block_until_ready(head_forward(x, wk, wq, wv))

    ref = head_reference(x, wk, wq, wv)
    assert out.shape == (B, T, H)
    # Tolerance loosened vs the pure-f32 version: the kernel feeds the MXU in
    # bf16 (f32 accumulation) and uses the EUP approximate reciprocal.
    assert jnp.allclose(out, ref, atol=3e-2, rtol=3e-2), "mismatch vs reference"

    print("KERNEL_OK")
</pallas_src>

<mosaic_0001>
module attributes {stable_mosaic.version = 11 : i64} {
  func.func @_head_kernel(%arg0: memref<2x8x32xf32, #tpu.memory_space<vmem>>, %arg1: memref<32x48xf32, #tpu.memory_space<vmem>>, %arg2: memref<2x8x16xf32, #tpu.memory_space<vmem>>) attributes {dimension_semantics = [], scalar_prefetch = 0 : i64, scratch_operands = 0 : i64, tpu.core_type = #tpu.core_type<tc>} {
    %c0 = arith.constant 0 : index
    %c0_0 = arith.constant 0 : index
    %c0_1 = arith.constant 0 : index
    %0 = vector.load %arg0[%c0, %c0_0, %c0_1] : memref<2x8x32xf32, #tpu.memory_space<vmem>>, vector<2x8x32xf32>
    %1 = arith.truncf %0 : vector<2x8x32xf32> to vector<2x8x32xbf16>
    %c0_2 = arith.constant 0 : index
    %c0_3 = arith.constant 0 : index
    %2 = vector.load %arg1[%c0_2, %c0_3] : memref<32x48xf32, #tpu.memory_space<vmem>>, vector<32x48xf32>
    %3 = arith.truncf %2 : vector<32x48xf32> to vector<32x48xbf16>
    %cst = arith.constant dense<0.000000e+00> : vector<2x8x48xf32>
    %4 = tpu.matmul %1, %3, %cst {dimension_numbers = #tpu.dot_dimension_numbers<[2], [0], [0, 1], [1], [0, 0, 0, 1, 1, 1], [], []>} : vector<2x8x32xbf16>, vector<32x48xbf16>, vector<2x8x48xf32> -> vector<2x8x48xf32>
    %5 = vector.extract_strided_slice %4 {offsets = [0, 0, 0], sizes = [2, 8, 16], strides = [1, 1, 1]} : vector<2x8x48xf32> to vector<2x8x16xf32>
    %6 = arith.truncf %5 : vector<2x8x16xf32> to vector<2x8x16xbf16>
    %7 = vector.extract_strided_slice %4 {offsets = [0, 0, 16], sizes = [2, 8, 16], strides = [1, 1, 1]} : vector<2x8x48xf32> to vector<2x8x16xf32>
    %8 = arith.truncf %7 : vector<2x8x16xf32> to vector<2x8x16xbf16>
    %9 = vector.extract_strided_slice %4 {offsets = [0, 0, 32], sizes = [2, 8, 16], strides = [1, 1, 1]} : vector<2x8x48xf32> to vector<2x8x16xf32>
    %10 = arith.truncf %9 : vector<2x8x16xf32> to vector<2x8x16xbf16>
    "tpu.trace_start"() <{level = 10 : i32, message = "btd,bsd->bts"}> : () -> ()
    %cst_4 = arith.constant dense<0.000000e+00> : vector<2x8x8xf32>
    %11 = tpu.matmul %8, %6, %cst_4 {dimension_numbers = #tpu.dot_dimension_numbers<[2], [2], [1], [1], [0, 0, 0, 1, 1, 1], [0], [0]>} : vector<2x8x16xbf16>, vector<2x8x16xbf16>, vector<2x8x8xf32> -> vector<2x8x8xf32>
    "tpu.trace_stop"() : () -> ()
    %cst_5 = arith.constant dense<0xFF800000> : vector<2x8xf32>
    %12 = vector.multi_reduction <maximumf>, %11, %cst_5 [2] : vector<2x8x8xf32> to vector<2x8xf32>
    %13 = vector.shape_cast %12 : vector<2x8xf32> to vector<2x8x1xf32>
    %14 = vector.broadcast %13 : vector<2x8x1xf32> to vector<2x8x8xf32>
    %15 = arith.subf %11, %14 : vector<2x8x8xf32>
    %16 = math.exp %15 : vector<2x8x8xf32>
    %cst_6 = arith.constant dense<0.000000e+00> : vector<2x8xf32>
    %17 = vector.multi_reduction <add>, %16, %cst_6 [2] : vector<2x8x8xf32> to vector<2x8xf32>
    %18 = vector.shape_cast %17 : vector<2x8xf32> to vector<2x8x1xf32>
    %19 = tpu.reciprocal %18 {approx = true} : vector<2x8x1xf32> -> vector<2x8x1xf32>
    %20 = vector.broadcast %19 : vector<2x8x1xf32> to vector<2x8x8xf32>
    %21 = arith.mulf %16, %20 : vector<2x8x8xf32>
    %22 = arith.truncf %21 : vector<2x8x8xf32> to vector<2x8x8xbf16>
    "tpu.trace_start"() <{level = 10 : i32, message = "bts,bsd->btd"}> : () -> ()
    %cst_7 = arith.constant dense<0.000000e+00> : vector<2x8x16xf32>
    %23 = tpu.matmul %22, %10, %cst_7 {dimension_numbers = #tpu.dot_dimension_numbers<[2], [1], [1], [2], [0, 0, 0, 1, 1, 2], [0], [0]>} : vector<2x8x8xbf16>, vector<2x8x16xbf16>, vector<2x8x16xf32> -> vector<2x8x16xf32>
    "tpu.trace_stop"() : () -> ()
    %c0_8 = arith.constant 0 : index
    %c0_9 = arith.constant 0 : index
    %c0_10 = arith.constant 0 : index
    %24 = vector.load %arg2[%c0_8, %c0_9, %c0_10] : memref<2x8x16xf32, #tpu.memory_space<vmem>>, vector<2x8x16xf32>
    tpu.vector_store %arg2[%c0_8, %c0_9, %c0_10], %23 {strides = array<i32>} : memref<2x8x16xf32, #tpu.memory_space<vmem>>, vector<2x8x16xf32>,
    return
  }
}

</mosaic_0001>

<bundles_post_ra>
// kernel: tpu_custom_call.1
= control target key start
LH: loop header
LB: loop body
LE: loop exit
PB: predicated region body
PF: predicated region fallthrough
CT: control target
= control target key end

     0   :  { %7 = vsyncpa [#allocation3], 0  ;;  %s571_s0 = inlined_call_operand.hbm [shape: f32[2,8,32], index: 0, kind: input, shape index: {}]   ;;  %s572_s1 = inlined_call_operand.hbm [shape: f32[32,48], index: 1, kind: input, shape index: {}]   ;;  %s573_s2 = inlined_call_operand.hbm [shape: f32[2,8,16], index: 2, kind: output, shape index: {}]  }
   0x1   :  { %8 = vsyncpa [#allocation6], 0 }
   0x2   :  { %9 = vsyncpa [#allocation4], 0  ;;  %s483_s9 = smov [#allocation2]   ;;  %s411_s13 = scalar_lea.hbm %s571_s0, 256 }
   0x3   :  { %s15_s10 = sshll.u32 %s483_s9, 4  ;;  %p412_p0 = scmp.ne.s32.totalorder %s571_s0, %s411_s13  ;;  %s16_s10 = int_to_ptr.vmem [resolvable:$true] %s15_s10 }
   0x4   :  { %p415_p1 = scmp.lt.u32.totalorder %s411_s13, %s571_s0 }
   0x6   :  { %p417_p2 = pnand %p415_p1, %p412_p0 }
   0x8   :  { %420 = shalt.err (!%p417_p2)
}
   0x9   :  { %s421_s18 = scalar_lea.vmem %s16_s10, 256  ;;  %p426_p4 = scmp.lt.s32.totalorder %s16_s10, %s16_s10 }
   0xa   :  { %p422_p3 = scmp.ne.s32.totalorder %s16_s10, %s421_s18  ;;  %p427_p5 = scmp.lt.s32.totalorder %s421_s18, %s421_s18 }
   0xc   :  { %p428_p6 = por %p427_p5, %p426_p4 }
   0xe   :  { %p429_p7 = pnand %p428_p6, %p422_p3 }
  0x10   :  { %432 = shalt.err (!%p429_p7)
}
  0x11   :  { %s484_s19 = smov 128   ;;  %s485_s20 = smov 8  }
  0x12   :  { %21 = dma.hbm_to_vmem [thread:$0]  %s571_s0, 256, %s16_s10, [#allocation3], %s484_s19, %s484_s19, %s485_s20  }
  0x13   :  { %s486_s23 = smov [#allocation5]   ;;  %s433_s27 = scalar_lea.hbm %s572_s1, 512 }
  0x14   :  { %s27_s24 = sshll.u32 %s486_s23, 4  ;;  %p434_p8 = scmp.ne.s32.totalorder %s572_s1, %s433_s27  ;;  %s28_s24 = int_to_ptr.vmem [resolvable:$true] %s27_s24 }
  0x15   :  { %p437_p9 = scmp.lt.u32.totalorder %s433_s27, %s572_s1 }
  0x17   :  { %p439_p10 = pnand %p437_p9, %p434_p8 }
  0x19   :  { %442 = shalt.err (!%p439_p10)
}
  0x1a   :  { %s443_s4 = scalar_lea.vmem %s28_s24, 512  ;;  %p448_p12 = scmp.lt.s32.totalorder %s28_s24, %s28_s24 }
  0x1b   :  { %p444_p11 = scmp.ne.s32.totalorder %s28_s24, %s443_s4  ;;  %p449_p13 = scmp.lt.s32.totalorder %s443_s4, %s443_s4 }
  0x1d   :  { %p450_p0 = por %p449_p13, %p448_p12 }
  0x1f   :  { %p451_p1 = pnand %p450_p0, %p444_p11 }
  0x21   :  { %454 = shalt.err (!%p451_p1)
}
  0x22   :  { %33 = dma.hbm_to_vmem [thread:$0]  %s572_s1, 512, %s28_s24, [#allocation6], %s484_s19, %s484_s19, %s485_s20  }
  0x23   :  { %477 = dma.done.wait [#allocation3], 256  }
  0x24   :  { %478 = vsyncadd [#allocation3], 4294967040 }
  0x25   :  { %479 = dma.done.wait [#allocation6], 512  }
  0x26   :  { %480 = vsyncadd [#allocation6], 4294966784  ;;  %v487_v0 = vmov 0.0   ;;  %vm488_vm0 = vmmov 0   ;;  %v45_v1 = vld [vmem:[#allocation5] sm:$0xff]  ;;  %v46_v2 = vld [vmem:[#allocation5 + $0x8] sm:$0xff] }
  0x27   :  { %362 = vmatprep.subr.bf16.mxu0 %v487_v0  ;;  %366 = vmatprep.mubr.msk.bf16.mxu0 %vm488_vm0, %v487_v0  ;;  %v47_v3 = vld [vmem:[#allocation5 + $0x10] sm:$0xff]  ;;  %v49_v4 = vpack.c.bf16 %v46_v2, %v45_v1  ;;  %v48_v5 = vld [vmem:[#allocation5 + $0x18] sm:$0xff]  ;;  %vm56_vm1 = vcmask 261120   ;;  %vm106_vm2 = vcmask 130048   ;;  %s489_s1 = smov 112   ;;  %vm202_vm3 = vcmask 64512  }
  0x28   :  { %370 = vmatprep.subr.bf16.mxu1 %v487_v0  ;;  %372 = vmatprep.mubr.msk.bf16.mxu1 %vm488_vm0, %v487_v0  ;;  %v50_v6 = vpack.c.bf16 %v48_v5, %v47_v3  ;;  %v41_v7 = vld [vmem:[#allocation2] sm:$0xff]  ;;  %v42_v8 = vld [vmem:[#allocation2 + $0x8] sm:$0xff]  ;;  %s490_s6 = smov 96   ;;  %vm232_vm4 = vcmask 1043456   ;;  %s491_s7 = smov [#allocation7]  }
  0x29   :  { %363 = vmatpush3.bf16.msra.mxu0 %v49_v4  ;;  %v350_v9 = vpack.c.bf16 %v42_v8, %v41_v7  ;;  %s331_s8 = sshll.u32 %s491_s7, 4  ;;  %s332_s8 = int_to_ptr.vmem [resolvable:$true] %s331_s8 }
  0x2a   :  { %364 = vmatprep.subr.bf16.mxu0 %v487_v0  ;;  %s455_s9 = scalar_lea.vmem %s332_s8, 256  ;;  %p460_p3 = scmp.lt.s32.totalorder %s332_s8, %s332_s8 }
  0x2b   :  { %p456_p2 = scmp.ne.s32.totalorder %s332_s8, %s455_s9  ;;  %p461_p4 = scmp.lt.s32.totalorder %s455_s9, %s455_s9 }
  0x2d   :  { %365 = vmatpush3.bf16.msra.mxu0 %v50_v6  ;;  %p462_p5 = por %p461_p4, %p460_p3 }
  0x2e   :  { %376 = vmatprep.subr.bf16.mxu0 %v487_v0 }
  0x2f   :  { %p463_p6 = pnand %p462_p5, %p456_p2 }
  0x30   :  { %367 = vmatmul.mubr.msk.bf16.vlgmr.msra.gmra.mrb[0].mxu0 %vm56_vm1, %v350_v9 }
  0x31   :  { %378 = vmatprep.mubr.msk.bf16.mxu0 %vm488_vm0, %v487_v0 }
 0x103   :  { %v94_v10 = vpop.f32.mrb[0].mxu0 }
 0x104   :  { %v101_v11 = vpack.c.bf16 %v94_v10, %v94_v10  ;;  %v368_v12 = vpop.f32.mrb[1].mxu0 }
 0x105   :  { %v97_v13 = vpop.f32.mrb[2].mxu0 }
 0x106   :  { %v102_v14 = vpack.c.bf16 %v97_v13, %v97_v13  ;;  %104 = vrot.lane.b32.xlu0 %v101_v11, %s489_s1  ;;  %v369_v15 = vpop.f32.mrb[3].mxu0  ;;  %v111_v16 = vsel %vm106_vm2, %v101_v11, 0 }
 0x107   :  { %371 = vmatpush3.bf16.xpose.msra.mxu1 %v111_v16 }
 0x108   :  { %v160_v17 = vsel %vm106_vm2, %v102_v14, 0  ;;  %382 = vmatprep.subr.bf16.mxu1 %v487_v0 }
 0x109   :  { %377 = vmatpush3.bf16.xpose.msra.mxu0 %v160_v17 }
 0x10a   :  { %154 = vrot.lane.b32.xlu0 %v102_v14, %s489_s1  ;;  %388 = vmatprep.subr.bf16.mxu0 %v487_v0 }
 0x178   :  { %v105_v18 = vpop.permute.xlu0 %104 }
 0x179   :  { %373 = vmatmul.mubr.msk.bf16.vlgmr.msra.gmra.mrb[0].mxu1 %vm106_vm2, %v105_v18 }
 0x17a   :  { %384 = vmatprep.mubr.msk.bf16.mxu1 %vm488_vm0, %v487_v0 }
 0x17c   :  { %v155_v19 = vpop.permute.xlu0 %154 }
 0x17d   :  { %379 = vmatmul.mubr.msk.bf16.vlgmr.msra.gmra.mrb[4].mxu0 %vm106_vm2, %v155_v19 }
 0x17e   :  { %390 = vmatprep.mubr.msk.bf16.mxu0 %vm488_vm0, %v487_v0 }
 0x24c   :  { %v147_v20 = vpop.f32.mrb[0].mxu1 }
 0x24d   :  { %v374_v21 = vpop.f32.mrb[1].mxu1  ;;  %v203_v22 = vsel %vm202_vm3, %v147_v20, -inf }
 0x24e   :  { %204 = vmax.xlane.f32.xlu1 %v203_v22  ;;  %v150_v23 = vpop.f32.mrb[2].mxu1 }
 0x24f   :  { %v375_v24 = vpop.f32.mrb[3].mxu1 }
 0x250   :  { %v196_v25 = vpop.f32.mrb[4].mxu0 }
 0x251   :  { %v380_v26 = vpop.f32.mrb[5].mxu0  ;;  %v206_v27 = vsel %vm202_vm3, %v196_v25, -inf }
 0x252   :  { %207 = vmax.xlane.f32.xlu1 %v206_v27  ;;  %v199_v28 = vpop.f32.mrb[6].mxu0 }
 0x253   :  { %v381_v29 = vpop.f32.mrb[7].mxu0 }
 0x263   :  { %227 = vrot.lane.b32.xlu1 %v101_v11, %s490_s6 }
 0x2db   :  { %v205_v30 = vpop.xlane.xlu1 %204 }
 0x2dc   :  { %v209_v31 = vsub.f32 %v147_v20, %v205_v30 }
 0x2de   :  { %v211_v32 = vmul.f32 1.442695, %v209_v31 }
 0x2df   :  { %v208_v33 = vpop.xlane.xlu1 %207 }
 0x2e0   :  { %403 = vpow2.f32 %v211_v32  ;;  %v210_v34 = vsub.f32 %v196_v25, %v208_v33 }
 0x2e2   :  { %v213_v35 = vmul.f32 1.442695, %v210_v34 }
 0x2e3   :  { %v228_v36 = vpop.permute.xlu1 %227 }
 0x2e4   :  { %405 = vpow2.f32 %v213_v35  ;;  %v234_v37 = vsel %vm232_vm4, %v228_v36, 0 }
 0x2e5   :  { %383 = vmatpush3.bf16.msra.mxu1 %v234_v37 }
 0x2ea   :  { %v404_v38 = vpop.eup %403 }
 0x2eb   :  { %v215_v39 = vsel %vm202_vm3, %v404_v38, 0.0 }
 0x2ec   :  { %216 = vadd.xlane.f32.xlu0 %v215_v39 }
 0x2ee   :  { %v406_v40 = vpop.eup %405 }
 0x2ef   :  { %v218_v41 = vsel %vm202_vm3, %v406_v40, 0.0 }
 0x2f0   :  { %219 = vadd.xlane.f32.xlu1 %v218_v41 }
 0x301   :  { %276 = vrot.lane.b32.xlu1 %v102_v14, %s490_s6 }
 0x379   :  { %v217_v42 = vpop.xlane.xlu0 %216 }
 0x37a   :  { %407 = vrcp.f32 %v217_v42 }
 0x37d   :  { %v220_v43 = vpop.xlane.xlu1 %219 }
 0x37e   :  { %409 = vrcp.f32 %v220_v43 }
 0x381   :  { %v277_v44 = vpop.permute.xlu1 %276 }
 0x382   :  { %v282_v45 = vsel %vm232_vm4, %v277_v44, 0 }
 0x383   :  { %389 = vmatpush3.bf16.msra.mxu0 %v282_v45 }
 0x384   :  { %v408_v46 = vpop.eup %407 }
 0x385   :  { %v223_v47 = vmul.f32 %v408_v46, %v404_v38 }
 0x387   :  { %v225_v48 = vpack.c.bf16 %v223_v47, %v223_v47 }
 0x388   :  { %v410_v49 = vpop.eup %409 }
 0x389   :  { %v224_v50 = vmul.f32 %v410_v49, %v406_v40  ;;  %385 = vmatmul.mubr.msk.bf16.vlgmr.msra.gmra.mrb[4].mxu1 %vm202_vm3, %v225_v48 }
 0x38b   :  { %v226_v51 = vpack.c.bf16 %v224_v50, %v224_v50 }
 0x38d   :  { %391 = vmatmul.mubr.msk.bf16.vlgmr.msra.gmra.mrb[8].mxu0 %vm202_vm3, %v226_v51 }
 0x45c   :  { %v270_v52 = vpop.f32.mrb[4].mxu1 }
 0x45d   :  { %324 = vst.msk [vmem:[#allocation7] sm:$0xff] %vm106_vm2, %v270_v52  ;;  %v386_v53 = vpop.f32.mrb[5].mxu1 }
 0x45e   :  { %v273_v54 = vpop.f32.mrb[6].mxu1 }
 0x45f   :  { %v387_v55 = vpop.f32.mrb[7].mxu1 }
 0x460   :  { %v318_v56 = vpop.f32.mrb[8].mxu0 }
 0x461   :  { %325 = vst.msk [vmem:[#allocation7 + $0x8] sm:$0xff] %vm106_vm2, %v318_v56  ;;  %v392_v57 = vpop.f32.mrb[9].mxu0 }
 0x462   :  { %v321_v58 = vpop.f32.mrb[10].mxu0 }
 0x463   :  { %466 = shalt.err (!%p463_p6)
}
 0x464   :  { %s467_s12 = scalar_lea.hbm %s573_s2, 256 }
 0x465   :  { %p468_p7 = scmp.ne.s32.totalorder %s573_s2, %s467_s12  ;;  %p471_p8 = scmp.lt.u32.totalorder %s467_s12, %s573_s2 }
 0x467   :  { %p473_p9 = pnand %p471_p8, %p468_p7 }
 0x469   :  { %476 = shalt.err (!%p473_p9)
}
 0x46a   :  { %337 = dma.vmem_to_hbm [thread:$0]  %s332_s8, 256, %s573_s2, [#allocation4], %s484_s19, %s484_s19, %s485_s20   ;;  %v393_v59 = vpop.f32.mrb[11].mxu0 }
 0x46b   :  { %481 = dma.done.wait [#allocation4], 256  }
 0x46c   :  { %482 = vsyncadd [#allocation4], 4294967040 }
 0x46d   :  { %341 = vsyncpa [#allocation3], 1 }
 0x46e   :  { %342 = vsyncpa [#allocation6], 1 }
 0x46f   :  { %343 = vsyncpa [#allocation4], 1 }

</bundles_post_ra>
